<compile_context>
chip_gen: v5e
topology: v5e:2x2
jax: 0.10.0
libtpu: 0.0.40
codegen_flags: <defaults>
</compile_context>

<pallas_src>
import math

import jax
import jax.numpy as jnp
from jax.experimental import pallas as pl
from jax.experimental.pallas import tpu as pltpu

_SQRT2 = math.sqrt(2.0)


def _l0prox_kernel(lbdz_ref, u_ref, x_ref, o_ref):
    # lbdz_ref: (tm, 1) f32; u_ref / x_ref / o_ref: (tm, tn) in u.dtype
    az = jnp.asarray(_SQRT2, dtype=jnp.float32) * lbdz_ref[...]     # (tm, 1)
    x = x_ref[...]
    sz = u_ref[...] - x                                              # (tm, tn)
    keep = jnp.abs(sz).astype(jnp.float32) > az                      # f32 compare
    o_ref[...] = x + jnp.where(keep, sz, jnp.zeros_like(sz))


def _sublane_multiple(itemsize):
    # Packed sublane granularity: f32 -> 8, bf16 -> 16, int8/fp8 -> 32.
    return max(8, 32 // max(1, itemsize))


def _even_block_count(B, tm, sub):
    """Shrink tm (in sublane-multiple steps) so pl.cdiv(B, tm) is even."""
    nb = -(-B // tm)
    if nb <= 1 or nb % 2 == 0:
        return tm
    t = tm
    while t > sub:
        t -= sub
        if (-(-B // t)) % 2 == 0:
            return t
    return tm


def _choose_tiles(B, N, itemsize, budget_bytes):
    """Pick (tm, tn) keeping the double-buffered footprint (3 arrays x 2
    buffers) under `budget_bytes`, with lane-dense, sublane-aligned tiles."""
    sub = _sublane_multiple(itemsize)
    elems_budget = max(1, budget_bytes // (6 * itemsize))
    total_bytes = B * N * itemsize
    big = total_bytes >= (4 << 20)   # each half >= ~2 MiB -> split can pay off

    if N <= elems_budget:
        # Preferred path: lane-dense full-N rows, 1-D grid over B.
        rows = max(1, elems_budget // N)
        if rows >= B:
            tm = B
        else:
            tm = min(B, max(sub, (rows // sub) * sub))
        # v7x-only benefit: split the batch axis so both TensorCores stream
        # DMA — but only when each block is big enough to amortize the ~0.35us
        # grid-step overhead (otherwise it's pure serial cost on v5e/v6e).
        if tm == B and big and B >= 2 * sub:
            half = (B + 1) // 2
            tm = max(sub, ((half + sub - 1) // sub) * sub)
        if tm < B and big:
            tm = _even_block_count(B, tm, sub)
        return tm, N

    # Huge-N fallback: 2-D grid with a large lane-dense tn (multiple of 128).
    tm = min(B, sub)
    tn = max(128, ((elems_budget // max(1, tm)) // 128) * 128)
    return tm, tn


def l0norm_prox_batch(u, x, lbdz, *, vmem_budget_bytes=12 << 20,
                      min_pallas_bytes=256 << 10, force_pallas=False):
    """u, x: (B, N); lbdz: (B,) or (B, 1)  ->  (B, N)."""
    B, N = u.shape
    itemsize = jnp.dtype(u.dtype).itemsize
    lbdz_f32 = jnp.reshape(lbdz, (B, 1)).astype(jnp.float32)

    # Tiny-input / narrow-N escape hatch: kernel-launch + DMA setup dominates
    # for sub-~256 KiB problems, and N < 128 forces masked partial-lane
    # stores; fused XLA wins outright there.
    if not force_pallas and (B * N * itemsize < min_pallas_bytes or N < 128):
        az = jnp.asarray(_SQRT2, jnp.float32) * lbdz_f32
        sz = u - x
        keep = jnp.abs(sz).astype(jnp.float32) > az
        return x + jnp.where(keep, sz, jnp.zeros_like(sz))

    tm, tn = _choose_tiles(B, N, itemsize, vmem_budget_bytes)

    if tn == N:
        # 1-D grid over batch rows; output blocks are full-lane-width (N).
        grid = (pl.cdiv(B, tm),)
        lbdz_spec = pl.BlockSpec((tm, 1), lambda i: (i, 0))
        tile_spec = pl.BlockSpec((tm, N), lambda i: (i, 0))
        dims = ("parallel",)
    else:
        # Fallback for very large N: 2-D grid with big lane-dense tn.
        grid = (pl.cdiv(B, tm), pl.cdiv(N, tn))
        lbdz_spec = pl.BlockSpec((tm, 1), lambda i, j: (i, 0))
        tile_spec = pl.BlockSpec((tm, tn), lambda i, j: (i, j))
        dims = ("parallel", "parallel")

    return pl.pallas_call(
        _l0prox_kernel,
        out_shape=jax.ShapeDtypeStruct((B, N), u.dtype),
        grid_spec=pltpu.PrefetchScalarGridSpec(
            num_scalar_prefetch=0,
            grid=grid,
            in_specs=[lbdz_spec, tile_spec, tile_spec],
            out_specs=tile_spec,
        ),
        compiler_params=pltpu.CompilerParams(
            dimension_semantics=dims,
            # 32 MiB: above v5e's 16 MiB default scoped VMEM, well under
            # v7x's 64 MiB physical ceiling.
            vmem_limit_bytes=32 << 20,
        ),
        cost_estimate=pl.CostEstimate(
            flops=3 * B * N,
            transcendentals=0,
            bytes_accessed=3 * B * N * itemsize + B * 4,
        ),
    )(lbdz_f32, u, x)


def _reference(u, x, lbdz):
    az = _SQRT2 * lbdz.reshape(-1, 1).astype(jnp.float32)
    sz = u - x
    return x + jnp.where(jnp.abs(sz).astype(jnp.float32) > az, sz, 0.0)


if __name__ == "__main__":
    B, N = 16, 256
    key = jax.random.PRNGKey(0)
    ku, kx, kl = jax.random.split(key, 3)
    u = jax.random.normal(ku, (B, N), dtype=jnp.float32)
    x = jax.random.normal(kx, (B, N), dtype=jnp.float32)
    lbdz = jax.random.uniform(kl, (B,), dtype=jnp.float32)  # positive thresholds

    ref = _reference(u, x, lbdz)

    # Exercise the Pallas kernel path explicitly (the shape is small enough
    # that the default heuristic would take the fused-XLA escape hatch).
    out = l0norm_prox_batch(u, x, lbdz, force_pallas=True)
    out = jax.block_until_ready(out)
    assert out.shape == (B, N) and out.dtype == jnp.float32
    assert jnp.allclose(out, ref, atol=1e-6, rtol=1e-6), "pallas mismatch vs reference"

    # Also check the small-input escape hatch gives the same result.
    out2 = jax.block_until_ready(l0norm_prox_batch(u, x, lbdz))
    assert jnp.allclose(out2, ref, atol=1e-6, rtol=1e-6), "fallback mismatch vs reference"

    print("KERNEL_OK")
</pallas_src>

<mosaic_0001>
module attributes {stable_mosaic.version = 11 : i64} {
  func.func @_l0prox_kernel(%arg0: i32, %arg1: memref<16x1xf32, #tpu.memory_space<vmem>>, %arg2: memref<16x256xf32, #tpu.memory_space<vmem>>, %arg3: memref<16x256xf32, #tpu.memory_space<vmem>>, %arg4: memref<16x256xf32, #tpu.memory_space<vmem>>) attributes {dimension_semantics = [#tpu.dimension_semantics<parallel>], iteration_bounds = array<i64: 1>, scalar_prefetch = 0 : i64, scratch_operands = 0 : i64, tpu.core_type = #tpu.core_type<tc>, window_params = [{transform_indices = @transform_0, window_bounds = array<i64: 16, 1>}, {transform_indices = @transform_1, window_bounds = array<i64: 16, 256>}, {transform_indices = @transform_2, window_bounds = array<i64: 16, 256>}, {transform_indices = @transform_3, window_bounds = array<i64: 16, 256>}]} {
    %c0 = arith.constant 0 : index
    %c0_0 = arith.constant 0 : index
    %0 = vector.load %arg1[%c0, %c0_0] : memref<16x1xf32, #tpu.memory_space<vmem>>, vector<16x1xf32>
    %cst = arith.constant 1.41421354 : f32
    %1 = vector.broadcast %cst : f32 to vector<16x1xf32>
    %2 = arith.mulf %1, %0 : vector<16x1xf32>
    %c0_1 = arith.constant 0 : index
    %c0_2 = arith.constant 0 : index
    %3 = vector.load %arg3[%c0_1, %c0_2] : memref<16x256xf32, #tpu.memory_space<vmem>>, vector<16x256xf32>
    %c0_3 = arith.constant 0 : index
    %c0_4 = arith.constant 0 : index
    %4 = vector.load %arg2[%c0_3, %c0_4] : memref<16x256xf32, #tpu.memory_space<vmem>>, vector<16x256xf32>
    %5 = arith.subf %4, %3 : vector<16x256xf32>
    %6 = math.absf %5 : vector<16x256xf32>
    %7 = vector.broadcast %2 : vector<16x1xf32> to vector<16x256xf32>
    %8 = arith.cmpf ogt, %6, %7 : vector<16x256xf32>
    %cst_5 = arith.constant 0.000000e+00 : f32
    %9 = vector.broadcast %cst_5 : f32 to vector<16x256xf32>
    %10 = arith.select %8, %5, %9 : vector<16x256xi1>, vector<16x256xf32>
    %11 = arith.addf %3, %10 : vector<16x256xf32>
    %c0_6 = arith.constant 0 : index
    %c0_7 = arith.constant 0 : index
    %12 = vector.load %arg4[%c0_6, %c0_7] : memref<16x256xf32, #tpu.memory_space<vmem>>, vector<16x256xf32>
    tpu.vector_store %arg4[%c0_6, %c0_7], %11 {strides = array<i32>} : memref<16x256xf32, #tpu.memory_space<vmem>>, vector<16x256xf32>,
    return
  }
  func.func @transform_0(%arg0: i32) -> (i32, i32) {
    %c0_i32 = arith.constant 0 : i32
    %c0_i32_0 = arith.constant 0 : i32
    return %arg0, %c0_i32 : i32, i32
  }
  func.func @transform_1(%arg0: i32) -> (i32, i32) {
    %c0_i32 = arith.constant 0 : i32
    %c0_i32_0 = arith.constant 0 : i32
    return %arg0, %c0_i32 : i32, i32
  }
  func.func @transform_2(%arg0: i32) -> (i32, i32) {
    %c0_i32 = arith.constant 0 : i32
    %c0_i32_0 = arith.constant 0 : i32
    return %arg0, %c0_i32 : i32, i32
  }
  func.func @transform_3(%arg0: i32) -> (i32, i32) {
    %c0_i32 = arith.constant 0 : i32
    %c0_i32_0 = arith.constant 0 : i32
    return %arg0, %c0_i32 : i32, i32
  }
}

</mosaic_0001>

<bundles_post_ra>
// kernel: tpu_custom_call.1
= control target key start
LH: loop header
LB: loop body
LE: loop exit
PB: predicated region body
PF: predicated region fallthrough
CT: control target
= control target key end

     0   :  { %8 = vsyncpa [#allocation3], 0  ;;  %s248_s0 = inlined_call_operand.vmem [shape: f32[16,1], index: 0, kind: input, shape index: {}]   ;;  %s249_s1 = inlined_call_operand.hbm [shape: f32[16,256], index: 1, kind: input, shape index: {}]   ;;  %s250_s2 = inlined_call_operand.hbm [shape: f32[16,256], index: 2, kind: input, shape index: {}]   ;;  %s251_s3 = inlined_call_operand.hbm [shape: f32[16,256], index: 3, kind: output, shape index: {}]  }
   0x1   :  { %9 = vsyncpa [#allocation6], 0 }
   0x2   :  { %10 = vsyncpa [#allocation4], 0  ;;  %s17_s14 = sshll.u32 %s249_s1, 4  ;;  %s198_s15 = smov [#allocation2]   ;;  %s18_s14 = int_to_ptr.hbm [resolvable:$true] %s17_s14 }
   0x3   :  { %s19_s16 = sshll.u32 %s198_s15, 4  ;;  %s30_s19 = sshll.u32 %s250_s2, 4  ;;  %s20_s16 = int_to_ptr.vmem [resolvable:$true] %s19_s16  ;;  %s31_s19 = int_to_ptr.hbm [resolvable:$true] %s30_s19 }
   0x4   :  { %s199_s20 = smov 256   ;;  %s200_s21 = smov 16  }
   0x5   :  { %25 = dma.hbm_to_vmem [thread:$0]  %s18_s14, 512, %s20_s16, [#allocation3], %s199_s20, %s199_s20, %s200_s21  }
   0x6   :  { %s201_s22 = smov [#allocation5]  }
   0x7   :  { %s32_s23 = sshll.u32 %s201_s22, 4  ;;  %s33_s23 = int_to_ptr.vmem [resolvable:$true] %s32_s23 }
   0x8   :  { %38 = dma.hbm_to_vmem [thread:$0]  %s31_s19, 512, %s33_s23, [#allocation6], %s199_s20, %s199_s20, %s200_s21  }
   0x9   :  { %192 = dma.done.wait [#allocation3], 512  }
   0xa   :  { %193 = vsyncadd [#allocation3], 4294966784 }
   0xb   :  { %194 = dma.done.wait [#allocation6], 512  }
   0xc   :  { %195 = vsyncadd [#allocation6], 4294966784  ;;  %v202_v0 = vmov 0   ;;  %v47_v1 = vld [vmem:[%s248_s0] sm:$0xff]  ;;  %v48_v3 = vld [vmem:[%s248_s0 + $0x8] sm:$0xff]  ;;  %s203_s0 = smov [#allocation7]  }
   0xd   :  { %119 = vset.pattern.permute.xlu0 %v202_v0  ;;  %v49_v2 = vmul.f32 1.4142135, %v47_v1  ;;  %v50_v4 = vmul.f32 1.4142135, %v48_v3  ;;  %v51_v5 = vld [vmem:[#allocation5] sm:$0xff]  ;;  %v52_v6 = vld [vmem:[#allocation5 + $0x8] sm:$0xff] }
   0xe   :  { %v55_v7 = vld [vmem:[#allocation2] sm:$0xff]  ;;  %v56_v8 = vld [vmem:[#allocation2 + $0x8] sm:$0xff]  ;;  %v53_v13 = vld [vmem:[#allocation5 + $0x10] sm:$0xff]  ;;  %s97_s26 = sshll.u32 %s203_s0, 4  ;;  %s99_s29 = sshll.u32 %s251_s3, 4  ;;  %s98_s26 = int_to_ptr.vmem [resolvable:$true] %s97_s26  ;;  %s100_s29 = int_to_ptr.hbm [resolvable:$true] %s99_s29 }
   0xf   :  { %69 = vperm.xlu0 %119, %v49_v2   ;;  %v59_v9 = vsub.f32 %v55_v7, %v51_v5  ;;  %v60_v10 = vsub.f32 %v56_v8, %v52_v6  ;;  %v54_v14 = vld [vmem:[#allocation5 + $0x18] sm:$0xff]  ;;  %v57_v15 = vld [vmem:[#allocation2 + $0x10] sm:$0xff] }
  0x10   :  { %v58_v16 = vld [vmem:[#allocation2 + $0x18] sm:$0xff]  ;;  %v61_v18 = vsub.f32 %v57_v15, %v53_v13 }
  0x11   :  { %v63_v11 = vand.u32 2147483647, %v59_v9  ;;  %v64_v12 = vand.u32 2147483647, %v60_v10  ;;  %v62_v19 = vsub.f32 %v58_v16, %v54_v14 }
  0x12   :  { %v65_v24 = vand.u32 2147483647, %v61_v18 }
  0x13   :  { %v66_v25 = vand.u32 2147483647, %v62_v19 }
  0x17   :  { %74 = vperm.xlu0 %119, %v50_v4  }
  0x81   :  { %v70_v17 = vpop.permute.xlu0 %69 }
  0x82   :  { %vm77_vm0 = vcmp.gt.f32.partialorder %v63_v11, %v70_v17  ;;  %vm78_vm1 = vcmp.gt.f32.partialorder %v64_v12, %v70_v17 }
  0x83   :  { %v81_v20 = vsel %vm77_vm0, %v59_v9, 0.0  ;;  %v82_v21 = vsel %vm78_vm1, %v60_v10, 0.0 }
  0x84   :  { %v85_v22 = vadd.f32 %v81_v20, %v51_v5  ;;  %v86_v23 = vadd.f32 %v82_v21, %v52_v6 }
  0x86   :  { %89 = vst [vmem:[#allocation7] sm:$0xff] %v85_v22 }
  0x87   :  { %90 = vst [vmem:[#allocation7 + $0x8] sm:$0xff] %v86_v23 }
  0x89   :  { %v75_v26 = vpop.permute.xlu0 %74 }
  0x8a   :  { %vm79_vm2 = vcmp.gt.f32.partialorder %v65_v24, %v75_v26  ;;  %vm80_vm3 = vcmp.gt.f32.partialorder %v66_v25, %v75_v26 }
  0x8b   :  { %v83_v27 = vsel %vm79_vm2, %v61_v18, 0.0  ;;  %v84_v28 = vsel %vm80_vm3, %v62_v19, 0.0 }
  0x8c   :  { %v87_v29 = vadd.f32 %v83_v27, %v53_v13  ;;  %v88_v30 = vadd.f32 %v84_v28, %v54_v14 }
  0x8e   :  { %91 = vst [vmem:[#allocation7 + $0x10] sm:$0xff] %v87_v29 }
  0x8f   :  { %92 = vst [vmem:[#allocation7 + $0x18] sm:$0xff] %v88_v30 }
  0x90   :  { %105 = dma.vmem_to_hbm [thread:$0]  %s98_s26, 512, %s100_s29, [#allocation4], %s199_s20, %s199_s20, %s200_s21  }
  0x91   :  { %196 = dma.done.wait [#allocation4], 512  }
  0x92   :  { %197 = vsyncadd [#allocation4], 4294966784 }
  0x93   :  { %110 = vsyncpa [#allocation3], 1 }
  0x94   :  { %111 = vsyncpa [#allocation6], 1 }
  0x95   :  { %112 = vsyncpa [#allocation4], 1 }

</bundles_post_ra>
